<compile_context>
chip_gen: v6e
topology: v6e:2x2x1
jax: 0.10.0
libtpu: 0.0.40
codegen_flags: <defaults>
</compile_context>

<pallas_src>
import jax
import jax.numpy as jnp
from jax import lax
from jax.experimental import pallas as pl
from jax.experimental.pallas import tpu as pltpu

NUM_FEATURES = 64   # num_features (free variable in the original script)
OUT_FEATURES = 2
BATCH = 8


def linear_kernel(x_ref, w_ref, b_ref, o_ref):
    # x_ref: (TM, F)   w_ref: (O, F)   b_ref: (1, O)   o_ref: (TM, O)
    # Contract over the shared F axis (lhs dim 1, rhs dim 1): MXU consumes W
    # as-is, f32 accumulation; bias broadcast-add on the VPU. Output is f32,
    # so no trailing cast is needed.
    o_ref[...] = lax.dot_general(
        x_ref[...], w_ref[...],
        dimension_numbers=(((1,), (1,)), ((), ())),
        preferred_element_type=jnp.float32,
    ) + b_ref[...]


def perceptron_forward(x, w, b, *, block_batch=1024):
    B, F = x.shape
    O = w.shape[0]
    b2d = b.reshape(1, O).astype(jnp.float32)

    # Batch tile: a multiple of 8 sublanes, capped at block_batch (sized well
    # under the 32 MiB default scoped VMEM even on v7x: tm*F*4*2 buffers).
    tm = min(block_batch, max(8, ((B + 7) // 8) * 8))
    padded_b = ((B + tm - 1) // tm) * tm
    if padded_b != B:
        x = jnp.pad(x, ((0, padded_b - B), (0, 0)))
    grid = (padded_b // tm,)

    out = pl.pallas_call(
        linear_kernel,
        out_shape=jax.ShapeDtypeStruct((padded_b, O), jnp.float32),
        grid_spec=pltpu.PrefetchScalarGridSpec(
            num_scalar_prefetch=0,
            grid=grid,
            in_specs=[
                pl.BlockSpec((tm, F), lambda i: (i, 0)),   # x: tiled over batch
                pl.BlockSpec((O, F), lambda i: (0, 0)),    # W: broadcast (full array)
                pl.BlockSpec((1, O), lambda i: (0, 0)),    # b: broadcast (full array)
            ],
            out_specs=pl.BlockSpec((tm, O), lambda i: (i, 0)),
        ),
        compiler_params=pltpu.CompilerParams(
            # Batch tiles are independent -> shard across TensorCores on v7x;
            # harmless no-op on single-TC v5e/v6e.
            dimension_semantics=("parallel",),
        ),
        # Tell XLA's scheduler this custom call is tiny so surrounding ops
        # aren't serialized around it.
        cost_estimate=pl.CostEstimate(
            flops=2 * padded_b * F * O,
            transcendentals=0,
            bytes_accessed=(padded_b * F + O * F + O + padded_b * O) * 4,
        ),
    )(x, w, b2d)
    return out[:B]
    # TODO(synk): with O=2 every output store is a masked vst using 2/128 lanes;
    # if many such heads are fused, stack them so the output last dim is a
    # multiple of 128 (lane-dense stores).


if __name__ == "__main__":
    key = jax.random.PRNGKey(0)
    kx, kw, kb = jax.random.split(key, 3)

    # Deterministic synthetic parameters (shapes from nn.Linear(num_features, 2)).
    bound = 1.0 / jnp.sqrt(NUM_FEATURES)
    w = jax.random.uniform(kw, (OUT_FEATURES, NUM_FEATURES),
                           minval=-bound, maxval=bound, dtype=jnp.float32)
    b = jax.random.uniform(kb, (OUT_FEATURES,),
                           minval=-bound, maxval=bound, dtype=jnp.float32)
    x = jax.random.normal(kx, (BATCH, NUM_FEATURES), dtype=jnp.float32)

    out = perceptron_forward(x, w, b)
    out = jax.block_until_ready(out)

    # Reference check against plain JAX.
    ref = x @ w.T + b
    assert out.shape == (BATCH, OUT_FEATURES)
    assert jnp.allclose(out, ref, atol=1e-5, rtol=1e-5)

    print("KERNEL_OK")
</pallas_src>

<mosaic_0001>
module attributes {stable_mosaic.version = 11 : i64} {
  func.func @linear_kernel(%arg0: i32, %arg1: memref<8x64xf32, #tpu.memory_space<vmem>>, %arg2: memref<2x64xf32, #tpu.memory_space<vmem>>, %arg3: memref<1x2xf32, #tpu.memory_space<vmem>>, %arg4: memref<8x2xf32, #tpu.memory_space<vmem>>) attributes {dimension_semantics = [#tpu.dimension_semantics<parallel>], iteration_bounds = array<i64: 1>, scalar_prefetch = 0 : i64, scratch_operands = 0 : i64, tpu.core_type = #tpu.core_type<tc>, window_params = [{transform_indices = @transform_0, window_bounds = array<i64: 8, 64>}, {pipeline_mode = #tpu.pipeline_mode<synchronous>, transform_indices = @transform_1, window_bounds = array<i64: 2, 64>}, {pipeline_mode = #tpu.pipeline_mode<synchronous>, transform_indices = @transform_2, window_bounds = array<i64: 1, 2>}, {transform_indices = @transform_3, window_bounds = array<i64: 8, 2>}]} {
    %c0 = arith.constant 0 : index
    %c0_0 = arith.constant 0 : index
    %0 = vector.load %arg1[%c0, %c0_0] : memref<8x64xf32, #tpu.memory_space<vmem>>, vector<8x64xf32>
    %c0_1 = arith.constant 0 : index
    %c0_2 = arith.constant 0 : index
    %1 = vector.load %arg2[%c0_1, %c0_2] : memref<2x64xf32, #tpu.memory_space<vmem>>, vector<2x64xf32>
    %cst = arith.constant dense<0.000000e+00> : vector<8x2xf32>
    %2 = tpu.matmul %0, %1, %cst {dimension_numbers = #tpu.dot_dimension_numbers<[1], [1], [0], [0], [0, 0, 1, 0], [], []>} : vector<8x64xf32>, vector<2x64xf32>, vector<8x2xf32> -> vector<8x2xf32>
    %c0_3 = arith.constant 0 : index
    %c0_4 = arith.constant 0 : index
    %3 = vector.load %arg3[%c0_3, %c0_4] : memref<1x2xf32, #tpu.memory_space<vmem>>, vector<1x2xf32>
    %4 = vector.broadcast %3 : vector<1x2xf32> to vector<8x2xf32>
    %5 = arith.addf %2, %4 : vector<8x2xf32>
    %c0_5 = arith.constant 0 : index
    %c0_6 = arith.constant 0 : index
    %6 = vector.load %arg4[%c0_5, %c0_6] : memref<8x2xf32, #tpu.memory_space<vmem>>, vector<8x2xf32>
    tpu.vector_store %arg4[%c0_5, %c0_6], %5 {strides = array<i32>} : memref<8x2xf32, #tpu.memory_space<vmem>>, vector<8x2xf32>,
    return
  }
  func.func @transform_0(%arg0: i32) -> (i32, i32) {
    %c0_i32 = arith.constant 0 : i32
    %c0_i32_0 = arith.constant 0 : i32
    return %arg0, %c0_i32 : i32, i32
  }
  func.func @transform_1(%arg0: i32) -> (i32, i32) {
    %c0_i32 = arith.constant 0 : i32
    %c0_i32_0 = arith.constant 0 : i32
    %c0_i32_1 = arith.constant 0 : i32
    return %c0_i32, %c0_i32_0 : i32, i32
  }
  func.func @transform_2(%arg0: i32) -> (i32, i32) {
    %c0_i32 = arith.constant 0 : i32
    %c0_i32_0 = arith.constant 0 : i32
    %c0_i32_1 = arith.constant 0 : i32
    return %c0_i32, %c0_i32_0 : i32, i32
  }
  func.func @transform_3(%arg0: i32) -> (i32, i32) {
    %c0_i32 = arith.constant 0 : i32
    %c0_i32_0 = arith.constant 0 : i32
    return %arg0, %c0_i32 : i32, i32
  }
}

</mosaic_0001>

<bundles_post_ra>
// kernel: tpu_custom_call.1
= control target key start
LH: loop header
LB: loop body
LE: loop exit
PB: predicated region body
PF: predicated region fallthrough
CT: control target
= control target key end

     0   :  { %8 = vsyncpa [#allocation3], 0  ;;  %s226_s0 = inlined_call_operand.hbm [shape: f32[8,64], index: 0, kind: input, shape index: {}]   ;;  %s227_s1 = inlined_call_operand.hbm [shape: f32[2,64], index: 1, kind: input, shape index: {}]   ;;  %s228_s2 = inlined_call_operand.vmem [shape: f32[1,2], index: 2, kind: input, shape index: {}]   ;;  %s229_s3 = inlined_call_operand.vmem [shape: f32[8,2], index: 3, kind: output, shape index: {}]  }
   0x1   :  { %9 = vsyncpa [#allocation5], 0  ;;  %s190_s12 = smov [#allocation2]   ;;  %s191_s14 = smov [#allocation4]  }
   0x2   :  { %s16_s13 = sshll.u32 %s190_s12, 4  ;;  %s26_s15 = sshll.u32 %s191_s14, 4  ;;  %s17_s13 = int_to_ptr.vmem [resolvable:$true] %s16_s13  ;;  %s27_s15 = int_to_ptr.vmem [resolvable:$true] %s26_s15 }
   0x3   :  { %s154_s16 = scalar_lea.vmem %s17_s13, 128  ;;  %p159_p1 = scmp.lt.s32.totalorder %s17_s13, %s17_s13 }
   0x4   :  { %p155_p0 = scmp.ne.s32.totalorder %s17_s13, %s154_s16  ;;  %p160_p2 = scmp.lt.s32.totalorder %s154_s16, %s154_s16 }
   0x6   :  { %p161_p3 = por %p160_p2, %p159_p1 }
   0x8   :  { %p162_p4 = pnand %p161_p3, %p155_p0 }
   0xa   :  { %165 = shalt.err (!%p162_p4)
}
   0xb   :  { %19 = dma.hbm_to_vmem [thread:$0]  %s226_s0, 128, %s17_s13, [#allocation3]  }
   0xc   :  { %s174_s19 = scalar_lea.vmem %s27_s15, 32  ;;  %p179_p6 = scmp.lt.s32.totalorder %s27_s15, %s27_s15 }
   0xd   :  { %p175_p5 = scmp.ne.s32.totalorder %s27_s15, %s174_s19  ;;  %p180_p7 = scmp.lt.s32.totalorder %s174_s19, %s174_s19 }
   0xf   :  { %p181_p8 = por %p180_p7, %p179_p6 }
  0x11   :  { %p182_p9 = pnand %p181_p8, %p175_p5 }
  0x13   :  { %185 = shalt.err (!%p182_p9)
}
  0x14   :  { %29 = dma.hbm_to_vmem [thread:$0]  %s227_s1, 32, %s27_s15, [#allocation5]  }
  0x15   :  { %186 = dma.done.wait [#allocation3], 128  }
  0x16   :  { %187 = vsyncadd [#allocation3], 4294967168 }
  0x17   :  { %188 = dma.done.wait [#allocation5], 32  }
  0x18   :  { %189 = vsyncadd [#allocation5], 4294967264  ;;  %v192_v0 = vmov 0.0   ;;  %vm193_vm0 = vmmov 0   ;;  %vm47_vm1 = vcmask 523264   ;;  %v38_v2 = vld [vmem:[#allocation2] sm:$0xff] }
  0x19   :  { %137 = vmatprep.subr.mxu0 %v192_v0  ;;  %139 = vmatprep.mubr.msk.f32.mxu0 %vm193_vm0, %v192_v0  ;;  %v39_v1 = vld [vmem:[#allocation4] sm:$0x3]  ;;  %v132_v3 = vld [vmem:[%s228_s2] ss:$0 sm:$0xff]  ;;  %vm124_vm2 = vcmask 15360  }
  0x1a   :  { %138 = vmatpush3.xpose.msk.msra.mxu0 %vm47_vm1, %v39_v1 }
  0x1d   :  { %140 = vmatmul.mubr.msk.f32.vlgmr.msra.gmra.mxu0 %vm47_vm1, %v38_v2 }
  0xdd   :  { %v120_v4 = vpop.f32.mrf.mxu0 }
  0xde   :  { %v121_v5 = vadd.f32 %v132_v3, %v120_v4 }
  0xdf   :  { %v141_v6 = vpop.f32.mrf.mxu0 }
  0xe0   :  { %125 = vst.msk [vmem:[%s229_s3] sm:$0xff] %vm124_vm2, %v121_v5 }
  0xe1   :  { %130 = vsyncpa [#allocation3], 1 }
  0xe2   :  { %131 = vsyncpa [#allocation5], 1 }

</bundles_post_ra>
